<compile_context>
chip_gen: v6e
topology: v6e:2x2x1
jax: 0.10.0
libtpu: 0.0.40
codegen_flags: <defaults>
</compile_context>

<pallas_src>
import functools

import jax
import jax.numpy as jnp
from jax.experimental import pallas as pl
from jax.experimental.pallas import tpu as pltpu


def _round_up(x, m):
    return (x + m - 1) // m * m


def dqn_mlp_kernel(x_ref, w1_ref, b1_ref, w2_ref, b2_ref, w3_ref, b3_ref, q_ref):
    # Layer 1: Linear + ReLU (MXU matmul, f32 accumulation)
    h1 = jnp.dot(x_ref[...], w1_ref[...], preferred_element_type=jnp.float32)
    h1 = jnp.maximum(h1 + b1_ref[...], 0.0)
    # Layer 2: Linear + ReLU
    h2 = jnp.dot(h1, w2_ref[...], preferred_element_type=jnp.float32)
    h2 = jnp.maximum(h2 + b2_ref[...], 0.0)
    # Layer 3: Linear (q-values, no activation)
    q = jnp.dot(h2, w3_ref[...], preferred_element_type=jnp.float32)
    q_ref[...] = (q + b3_ref[...]).astype(q_ref.dtype)


@functools.partial(jax.jit, static_argnames=("block_b",))
def dqn_forward(state, w1, b1, w2, b2, w3, b3, *, block_b=512):
    """Fused DQN MLP forward. Weights stored (in, out) so y = x @ W + b matches
    PyTorch's y = x @ W.T + b. No HBM-side padding: feature dims are read/written
    full-extent, the batch axis is tiled with a cdiv grid (ragged tail masked)."""
    B, in_dims = state.shape
    f1 = w1.shape[1]
    f2 = w2.shape[1]
    n_actions = w3.shape[1]

    state = state.astype(jnp.float32)
    # Biases as (1, n) rows; reshape of a contiguous 1-D array is free.
    b1 = b1.reshape(1, -1)
    b2 = b2.reshape(1, -1)
    b3 = b3.reshape(1, -1)

    # Batch tile: multiple of 8 sublanes, capped at block_b.  Target >= 2
    # balanced grid steps when possible (two-TC megacore split on v7x; the
    # extra grid step costs ~0.35 us elsewhere, negligible).
    if B > 8:
        tb = min(block_b, _round_up(-(-B // 2), 8))
    else:
        tb = 8
    grid = (pl.cdiv(B, tb),)

    # Weights/biases: full-array blocks with a constant index_map -> stay
    # resident in VMEM across all batch tiles (no re-DMA per grid step).
    def const_spec(a):
        return pl.BlockSpec(a.shape, lambda i: (0, 0))

    q = pl.pallas_call(
        dqn_mlp_kernel,
        out_shape=jax.ShapeDtypeStruct((B, n_actions), jnp.float32),
        grid=grid,
        in_specs=[
            # state: tiled over batch, full-extent feature dim (== array dim).
            pl.BlockSpec((tb, in_dims), lambda i: (i, 0)),
            const_spec(w1), const_spec(b1),
            const_spec(w2), const_spec(b2),
            const_spec(w3), const_spec(b3),
        ],
        # output: unpadded, full-extent action dim; ragged last tile is masked.
        out_specs=pl.BlockSpec((tb, n_actions), lambda i: (i, 0)),
        compiler_params=pltpu.CompilerParams(
            dimension_semantics=("parallel",),  # batch tiles split across TCs (v7x)
        ),
    )(state, w1, b1, w2, b2, w3, b3)

    return q


def init_linear(key, in_features, out_features):
    """PyTorch nn.Linear default init: U(-1/sqrt(in), 1/sqrt(in))."""
    kw, kb = jax.random.split(key)
    bound = 1.0 / jnp.sqrt(jnp.float32(in_features))
    # Stored as (in, out) so the kernel computes x @ W.
    w = jax.random.uniform(kw, (in_features, out_features), jnp.float32,
                           minval=-bound, maxval=bound)
    b = jax.random.uniform(kb, (out_features,), jnp.float32,
                           minval=-bound, maxval=bound)
    return w, b


if __name__ == "__main__":
    # Small, forward-consistent shapes.  batch=200 exercises the two-tile
    # balanced split (104 + 96 rows) and the ragged-last-block masking path.
    batch = 200
    input_dims = 32
    fc1_dims = 64
    fc2_dims = 32
    n_actions = 8

    key = jax.random.PRNGKey(0)
    k_x, k1, k2, k3 = jax.random.split(key, 4)

    state = jax.random.normal(k_x, (batch, input_dims), jnp.float32)
    w1, b1 = init_linear(k1, input_dims, fc1_dims)
    w2, b2 = init_linear(k2, fc1_dims, fc2_dims)
    w3, b3 = init_linear(k3, fc2_dims, n_actions)

    q = dqn_forward(state, w1, b1, w2, b2, w3, b3)
    q = jax.block_until_ready(q)

    # Pure-JAX reference check (same math as the PyTorch module).
    h1 = jnp.maximum(state @ w1 + b1, 0.0)
    h2 = jnp.maximum(h1 @ w2 + b2, 0.0)
    q_ref = h2 @ w3 + b3
    assert q.shape == (batch, n_actions)
    assert jnp.allclose(q, q_ref, atol=1e-4, rtol=1e-4)

    print("KERNEL_OK")
</pallas_src>

<mosaic_0001>
module attributes {stable_mosaic.version = 11 : i64} {
  func.func @dqn_mlp_kernel(%arg0: i32, %arg1: memref<104x32xf32, #tpu.memory_space<vmem>>, %arg2: memref<32x64xf32, #tpu.memory_space<vmem>>, %arg3: memref<1x64xf32, #tpu.memory_space<vmem>>, %arg4: memref<64x32xf32, #tpu.memory_space<vmem>>, %arg5: memref<1x32xf32, #tpu.memory_space<vmem>>, %arg6: memref<32x8xf32, #tpu.memory_space<vmem>>, %arg7: memref<1x8xf32, #tpu.memory_space<vmem>>, %arg8: memref<104x8xf32, #tpu.memory_space<vmem>>) attributes {dimension_semantics = [#tpu.dimension_semantics<parallel>], iteration_bounds = array<i64: 2>, scalar_prefetch = 0 : i64, scratch_operands = 0 : i64, tpu.core_type = #tpu.core_type<tc>, window_params = [{transform_indices = @transform_0, window_bounds = array<i64: 104, 32>}, {pipeline_mode = #tpu.pipeline_mode<synchronous>, transform_indices = @transform_1, window_bounds = array<i64: 32, 64>}, {pipeline_mode = #tpu.pipeline_mode<synchronous>, transform_indices = @transform_2, window_bounds = array<i64: 1, 64>}, {pipeline_mode = #tpu.pipeline_mode<synchronous>, transform_indices = @transform_3, window_bounds = array<i64: 64, 32>}, {pipeline_mode = #tpu.pipeline_mode<synchronous>, transform_indices = @transform_4, window_bounds = array<i64: 1, 32>}, {pipeline_mode = #tpu.pipeline_mode<synchronous>, transform_indices = @transform_5, window_bounds = array<i64: 32, 8>}, {pipeline_mode = #tpu.pipeline_mode<synchronous>, transform_indices = @transform_6, window_bounds = array<i64: 1, 8>}, {transform_indices = @transform_7, window_bounds = array<i64: 104, 8>}]} {
    %c0 = arith.constant 0 : index
    %c0_0 = arith.constant 0 : index
    %0 = vector.load %arg1[%c0, %c0_0] : memref<104x32xf32, #tpu.memory_space<vmem>>, vector<104x32xf32>
    %c0_1 = arith.constant 0 : index
    %c0_2 = arith.constant 0 : index
    %1 = vector.load %arg2[%c0_1, %c0_2] : memref<32x64xf32, #tpu.memory_space<vmem>>, vector<32x64xf32>
    %cst = arith.constant dense<0.000000e+00> : vector<104x64xf32>
    %2 = tpu.matmul %0, %1, %cst {dimension_numbers = #tpu.dot_dimension_numbers<[1], [0], [0], [1], [0, 0, 1, 1], [], []>} : vector<104x32xf32>, vector<32x64xf32>, vector<104x64xf32> -> vector<104x64xf32>
    %c0_3 = arith.constant 0 : index
    %c0_4 = arith.constant 0 : index
    %3 = vector.load %arg3[%c0_3, %c0_4] : memref<1x64xf32, #tpu.memory_space<vmem>>, vector<1x64xf32>
    %4 = vector.broadcast %3 : vector<1x64xf32> to vector<104x64xf32>
    %5 = arith.addf %2, %4 : vector<104x64xf32>
    %cst_5 = arith.constant 0.000000e+00 : f32
    %6 = vector.broadcast %cst_5 : f32 to vector<104x64xf32>
    %7 = arith.maximumf %5, %6 : vector<104x64xf32>
    %c0_6 = arith.constant 0 : index
    %c0_7 = arith.constant 0 : index
    %8 = vector.load %arg4[%c0_6, %c0_7] : memref<64x32xf32, #tpu.memory_space<vmem>>, vector<64x32xf32>
    %cst_8 = arith.constant dense<0.000000e+00> : vector<104x32xf32>
    %9 = tpu.matmul %7, %8, %cst_8 {dimension_numbers = #tpu.dot_dimension_numbers<[1], [0], [0], [1], [0, 0, 1, 1], [], []>} : vector<104x64xf32>, vector<64x32xf32>, vector<104x32xf32> -> vector<104x32xf32>
    %c0_9 = arith.constant 0 : index
    %c0_10 = arith.constant 0 : index
    %10 = vector.load %arg5[%c0_9, %c0_10] : memref<1x32xf32, #tpu.memory_space<vmem>>, vector<1x32xf32>
    %11 = vector.broadcast %10 : vector<1x32xf32> to vector<104x32xf32>
    %12 = arith.addf %9, %11 : vector<104x32xf32>
    %cst_11 = arith.constant 0.000000e+00 : f32
    %13 = vector.broadcast %cst_11 : f32 to vector<104x32xf32>
    %14 = arith.maximumf %12, %13 : vector<104x32xf32>
    %c0_12 = arith.constant 0 : index
    %c0_13 = arith.constant 0 : index
    %15 = vector.load %arg6[%c0_12, %c0_13] : memref<32x8xf32, #tpu.memory_space<vmem>>, vector<32x8xf32>
    %cst_14 = arith.constant dense<0.000000e+00> : vector<104x8xf32>
    %16 = tpu.matmul %14, %15, %cst_14 {dimension_numbers = #tpu.dot_dimension_numbers<[1], [0], [0], [1], [0, 0, 1, 1], [], []>} : vector<104x32xf32>, vector<32x8xf32>, vector<104x8xf32> -> vector<104x8xf32>
    %c0_15 = arith.constant 0 : index
    %c0_16 = arith.constant 0 : index
    %17 = vector.load %arg7[%c0_15, %c0_16] : memref<1x8xf32, #tpu.memory_space<vmem>>, vector<1x8xf32>
    %18 = vector.broadcast %17 : vector<1x8xf32> to vector<104x8xf32>
    %19 = arith.addf %16, %18 : vector<104x8xf32>
    %c0_17 = arith.constant 0 : index
    %c0_18 = arith.constant 0 : index
    %20 = vector.load %arg8[%c0_17, %c0_18] : memref<104x8xf32, #tpu.memory_space<vmem>>, vector<104x8xf32>
    tpu.vector_store %arg8[%c0_17, %c0_18], %19 {strides = array<i32>} : memref<104x8xf32, #tpu.memory_space<vmem>>, vector<104x8xf32>,
    return
  }
  func.func @transform_0(%arg0: i32) -> (i32, i32) {
    %c0_i32 = arith.constant 0 : i32
    %c0_i32_0 = arith.constant 0 : i32
    return %arg0, %c0_i32 : i32, i32
  }
  func.func @transform_1(%arg0: i32) -> (i32, i32) {
    %c0_i32 = arith.constant 0 : i32
    %c0_i32_0 = arith.constant 0 : i32
    %c0_i32_1 = arith.constant 0 : i32
    return %c0_i32, %c0_i32_0 : i32, i32
  }
  func.func @transform_2(%arg0: i32) -> (i32, i32) {
    %c0_i32 = arith.constant 0 : i32
    %c0_i32_0 = arith.constant 0 : i32
    %c0_i32_1 = arith.constant 0 : i32
    return %c0_i32, %c0_i32_0 : i32, i32
  }
  func.func @transform_3(%arg0: i32) -> (i32, i32) {
    %c0_i32 = arith.constant 0 : i32
    %c0_i32_0 = arith.constant 0 : i32
    %c0_i32_1 = arith.constant 0 : i32
    return %c0_i32, %c0_i32_0 : i32, i32
  }
  func.func @transform_4(%arg0: i32) -> (i32, i32) {
    %c0_i32 = arith.constant 0 : i32
    %c0_i32_0 = arith.constant 0 : i32
    %c0_i32_1 = arith.constant 0 : i32
    return %c0_i32, %c0_i32_0 : i32, i32
  }
  func.func @transform_5(%arg0: i32) -> (i32, i32) {
    %c0_i32 = arith.constant 0 : i32
    %c0_i32_0 = arith.constant 0 : i32
    %c0_i32_1 = arith.constant 0 : i32
    return %c0_i32, %c0_i32_0 : i32, i32
  }
  func.func @transform_6(%arg0: i32) -> (i32, i32) {
    %c0_i32 = arith.constant 0 : i32
    %c0_i32_0 = arith.constant 0 : i32
    %c0_i32_1 = arith.constant 0 : i32
    return %c0_i32, %c0_i32_0 : i32, i32
  }
  func.func @transform_7(%arg0: i32) -> (i32, i32) {
    %c0_i32 = arith.constant 0 : i32
    %c0_i32_0 = arith.constant 0 : i32
    return %arg0, %c0_i32 : i32, i32
  }
}

</mosaic_0001>

<bundles_post_ra>
// kernel: dqn_forward.1
= control target key start
LH: loop header
LB: loop body
LE: loop exit
PB: predicated region body
PF: predicated region fallthrough
CT: control target
= control target key end

     0   :  { %s1663_s24 = smov 0   ;;  %s1665_s25 = smov 0   ;;  %s2057_s0 = inlined_call_operand.vmem [shape: f32[200,32], index: 0, kind: input, shape index: {}]   ;;  %s2058_s1 = inlined_call_operand.vmem [shape: f32[32,64], index: 1, kind: input, shape index: {}]   ;;  %s2059_s2 = inlined_call_operand.vmem [shape: f32[1,64], index: 2, kind: input, shape index: {}]   ;;  %s2060_s3 = inlined_call_operand.vmem [shape: f32[64,32], index: 3, kind: input, shape index: {}]   ;;  %s2061_s4 = inlined_call_operand.vmem [shape: f32[1,32], index: 4, kind: input, shape index: {}]   ;;  %s2062_s5 = inlined_call_operand.vmem [shape: f32[32,8], index: 5, kind: input, shape index: {}]   ;;  %s2063_s6 = inlined_call_operand.vmem [shape: f32[1,8], index: 6, kind: input, shape index: {}]   ;;  %s2064_s7 = inlined_call_operand.vmem [shape: f32[200,8], index: 7, kind: output, shape index: {}]  }
   0x1   :  { %s1667_s26 = smov 0  }
   0x2 LB: > { %s1676_s27 = sadd.s32 4294967295, %s1587_s26   ;;  %s1678_s28 = sadd.s32 1, %s1587_s26   ;;  %s1587_s26 = sphi %s1667_s26, %s2071_s26   ;;  %s1583_s25 = sphi %s1665_s25, %s2070_s25   ;;  %s1579_s24 = sphi %s1663_s24, %s2069_s24  }
   0x3   : > { %s173_s29 = ssub.s32 %s1587_s26, %s1678_s28  ;;  %s176_s30 = sadd.s32 1, %s1583_s25 }
   0x4   : > { %p174_p0 = scmp.eq.s32.totalorder %s173_s29, 0  ;;  %p186_p1 = scmp.ne.s32.totalorder %s1583_s25, %s1579_s24 }
   0x5   : > { %p187_p2 = scmp.eq.s32.totalorder %s1676_s27, 1  ;;  %p1168_p3 = scmp.ge.s32.totalorder %s1587_s26, 1 }
   0x6   : > { %s1686_s8 = scalar_select %p174_p0, %s1583_s25, %s176_s30  }
   0x7   : > { %p1688_p4 = por %p187_p2, %p186_p1  ;;  %p246_p5 = scmp.lt.s32.totalorder %s1587_s26, 3 }
   0x9   : > { %p247_p6 = pnand %p1168_p3, %p246_p5 }
   0xa   : > { %s1696_s12 = smul.u32 (!%p247_p6), 13, %s1676_s27 }
   0xb   : > { %250 = sbr.rel (%p247_p6) target bundleno = 716 (0x2cc), region = 48 }
   0xc   : > { %p286_p7 = scmp.lt.s32.totalorder (!%p247_p6), %s1696_s12, 24 }
  0x10   : > { %v316_v0 = vld [vmem:[%s2058_s1 + $0x18] sm:$0xff]  ;;  %v1621_v1 = vmov 0.0   ;;  %v315_v2 = vld [vmem:[%s2058_s1 + $0x10] sm:$0xff]  ;;  %vm1622_vm0 = vmmov 0   ;;  %v314_v3 = vld [vmem:[%s2058_s1 + $0x8] sm:$0xff]  ;;  %s287_s17 = scalar_select %p286_p7, %s1696_s12, 24 }
  0x11   : > { %1280 = vmatprep.subr.mxu0 %v1621_v1  ;;  %1288 = vmatprep.mubr.msk.f32.mxu0 %vm1622_vm0, %v1621_v1  ;;  %v313_v4 = vld [vmem:[%s2058_s1] sm:$0xff]  ;;  %vm324_vm1 = vcmask 261120   ;;  %v514_v6 = vld [vmem:[%s2060_s3 + $0x38] sm:$0xff]  ;;  %v513_v9 = vld [vmem:[%s2060_s3 + $0x30] sm:$0xff]  ;;  %vm522_vm2 = vcmask 523264   ;;  %vm885_vm3 = vcmask 64512  }
  0x12   : > { %1281 = vmatpush3.msra.mxu0 %v316_v0  ;;  %1429 = vmatprep.subr.mxu1 %v1621_v1  ;;  %s1169_s20 = sshll.u32 %s287_s17, 3  ;;  %v512_v11 = vld [vmem:[%s2060_s3 + $0x28] sm:$0xff]  ;;  %v511_v13 = vld [vmem:[%s2060_s3 + $0x20] sm:$0xff]  ;;  %v510_v15 = vld [vmem:[%s2060_s3 + $0x18] sm:$0xff]  ;;  %s1224_s30 = smul.u32 (%p1688_p4), 104, %s1676_s27 }
  0x13   : > { %1282 = vmatprep.subr.mxu0 %v1621_v1  ;;  %1433 = vmatpush3.msra.mxu1 %v316_v0  ;;  %s1721_s23 = scalar_lea.vmem %s2057_s0, %s1169_s20  ;;  %v509_v17 = vld [vmem:[%s2060_s3 + $0x10] sm:$0xff]  ;;  %v508_v19 = vld [vmem:[%s2060_s3 + $0x8] sm:$0xff]  ;;  %v507_v25 = vld [vmem:[%s2060_s3] sm:$0xff]  ;;  %s278_s20 = sand.u32 1, %s1579_s24  }
  0x14   : > { %1283 = vmatpush3.msra.mxu0 %v315_v2  ;;  %1430 = vmatprep.subr.mxu1 %v1621_v1  ;;  %v300_v5 = vld [vmem:[%s1721_s23] sm:$0xff]  ;;  %v301_v7 = vld [vmem:[%s1721_s23 + $0x8] sm:$0xff]  ;;  %v307_v8 = vld [vmem:[%s1721_s23 + $0x38] sm:$0xff]  ;;  %s1437_s21 = smul.u32 104, %s278_s20  ;;  %s907_s24 = ssub.s32 (%p1688_p4), 25, %s1696_s12 }
  0x15   : > { %1284 = vmatprep.subr.mxu0 %v1621_v1  ;;  %1434 = vmatpush3.msra.mxu1 %v315_v2  ;;  %v308_v10 = vld [vmem:[%s1721_s23 + $0x40] sm:$0xff]  ;;  %v302_v12 = vld [vmem:[%s1721_s23 + $0x10] sm:$0xff]  ;;  %v309_v14 = vld [vmem:[%s1721_s23 + $0x48] sm:$0xff]  ;;  %p908_p8 = scmp.lt.s32.totalorder (%p1688_p4), %s907_s24, 13  ;;  %s1975_s11 = scalar_lea.vmem (%p1688_p4), %s2064_s7, %s1224_s30  }
  0x16   : > { %1285 = vmatpush3.msra.mxu0 %v314_v3  ;;  %1431 = vmatprep.subr.mxu1 %v1621_v1  ;;  %v303_v16 = vld [vmem:[%s1721_s23 + $0x18] sm:$0xff]  ;;  %v310_v18 = vld [vmem:[%s1721_s23 + $0x50] sm:$0xff]  ;;  %v304_v20 = vld [vmem:[%s1721_s23 + $0x20] sm:$0xff]  ;;  %s1940_s29 = scalar_lea.vmem [#allocation2], %s1437_s21  }
  0x17   : > { %1286 = vmatprep.subr.mxu0 %v1621_v1  ;;  %1435 = vmatpush3.msra.mxu1 %v314_v3  ;;  %v311_v21 = vld [vmem:[%s1721_s23 + $0x58] sm:$0xff]  ;;  %v305_v22 = vld [vmem:[%s1721_s23 + $0x28] sm:$0xff]  ;;  %v312_v23 = vld [vmem:[%s1721_s23 + $0x60] sm:$0xff] }
  0x18   : > { %1287 = vmatpush3.msra.mxu0 %v313_v4  ;;  %1432 = vmatprep.subr.mxu1 %v1621_v1  ;;  %v306_v24 = vld [vmem:[%s1721_s23 + $0x30] sm:$0xff]  ;;  %v708_v26 = vld [vmem:[%s2062_s5 + $0x18] sm:$0xff]  ;;  %v706_v28 = vld [vmem:[%s2062_s5 + $0x8] sm:$0xff] }
  0x19   : > { %1289 = vmatmul.mubr.msk.f32.vlgmr.msra.gmra.mxu0 %vm324_vm1, %v300_v5  ;;  %1436 = vmatpush3.msra.mxu1 %v313_v4  ;;  %v707_v27 = vld [vmem:[%s2062_s5 + $0x10] sm:$0xff]  ;;  %v705_v29 = vld [vmem:[%s2062_s5] sm:$0xff] }
  0x1a   : > { %1291 = vmatprep.mubr.msk.f32.mxu0 %vm1622_vm0, %v1621_v1  ;;  %1309 = vmatprep.mubr.msk.f32.mxu1 %vm1622_vm0, %v1621_v1  ;;  %v1829_v30 = vld [vmem:[%s2059_s2] ss:$0 sm:$0xff] }
  0x1b   : > { %1310 = vmatmul.mubr.msk.f32.vlgmr.msra.gmra.mxu1 %vm324_vm1, %v307_v8  ;;  %1327 = vmatprep.subr.mxu1 %v1621_v1 }
  0x1c   : > { %1312 = vmatprep.mubr.msk.f32.mxu1 %vm1622_vm0, %v1621_v1  ;;  %1328 = vmatpush3.msra.mxu1 %v514_v6 }
  0x1d   : > { %1292 = vmatmul.mubr.msk.f32.gmra.mxu0 %vm324_vm1, %v301_v7  ;;  %1329 = vmatprep.subr.mxu1 %v1621_v1 }
  0x1e   : > { %1294 = vmatprep.mubr.msk.f32.mxu0 %vm1622_vm0, %v1621_v1  ;;  %1330 = vmatpush3.msra.mxu1 %v513_v9 }
  0x1f   : > { %1313 = vmatmul.mubr.msk.f32.gmra.mxu1 %vm324_vm1, %v308_v10  ;;  %1331 = vmatprep.subr.mxu1 %v1621_v1 }
  0x20   : > { %1315 = vmatprep.mubr.msk.f32.mxu1 %vm1622_vm0, %v1621_v1  ;;  %1332 = vmatpush3.msra.mxu1 %v512_v11 }
  0x21   : > { %1295 = vmatmul.mubr.msk.f32.gmra.mxu0 %vm324_vm1, %v302_v12  ;;  %1333 = vmatprep.subr.mxu1 %v1621_v1 }
  0x22   : > { %1297 = vmatprep.mubr.msk.f32.mxu0 %vm1622_vm0, %v1621_v1  ;;  %1334 = vmatpush3.msra.mxu1 %v511_v13 }
  0x23   : > { %1316 = vmatmul.mubr.msk.f32.gmra.mxu1 %vm324_vm1, %v309_v14  ;;  %1335 = vmatprep.subr.mxu1 %v1621_v1 }
  0x24   : > { %1318 = vmatprep.mubr.msk.f32.mxu1 %vm1622_vm0, %v1621_v1  ;;  %1336 = vmatpush3.msra.mxu1 %v510_v15 }
  0x25   : > { %1298 = vmatmul.mubr.msk.f32.gmra.mxu0 %vm324_vm1, %v303_v16  ;;  %1337 = vmatprep.subr.mxu1 %v1621_v1 }
  0x26   : > { %1300 = vmatprep.mubr.msk.f32.mxu0 %vm1622_vm0, %v1621_v1  ;;  %1338 = vmatpush3.msra.mxu1 %v509_v17 }
  0x27   : > { %1319 = vmatmul.mubr.msk.f32.gmra.mxu1 %vm324_vm1, %v310_v18  ;;  %1339 = vmatprep.subr.mxu1 %v1621_v1 }
  0x28   : > { %1321 = vmatprep.mubr.msk.f32.mxu1 %vm1622_vm0, %v1621_v1  ;;  %1340 = vmatpush3.msra.mxu1 %v508_v19 }
  0x29   : > { %1301 = vmatmul.mubr.msk.f32.gmra.mxu0 %vm324_vm1, %v304_v20  ;;  %1341 = vmatprep.subr.mxu1 %v1621_v1  ;;  %v1884_v20 = vld [vmem:[%s2061_s4] ss:$0 sm:$0xff] }
  0x2a   : > { %1303 = vmatprep.mubr.msk.f32.mxu0 %vm1622_vm0, %v1621_v1  ;;  %1382 = vmatprep.subr.mxu0 %v1621_v1 }
  0x2b   : > { %1322 = vmatmul.mubr.msk.f32.gmra.mxu1 %vm324_vm1, %v311_v21  ;;  %1383 = vmatpush3.msra.mxu0 %v708_v26 }
  0x2c   : > { %1324 = vmatprep.mubr.msk.f32.mxu1 %vm1622_vm0, %v1621_v1  ;;  %1342 = vmatpush3.msra.mxu1 %v507_v25 }
  0x2d   : > { %1304 = vmatmul.mubr.msk.f32.gmra.mxu0 %vm324_vm1, %v305_v22  ;;  %1384 = vmatprep.subr.mxu0 %v1621_v1 }
  0x2e   : > { %1306 = vmatprep.mubr.msk.f32.mxu0 %vm1622_vm0, %v1621_v1  ;;  %1385 = vmatpush3.msra.mxu0 %v707_v27 }
  0x2f   : > { %1325 = vmatmul.mubr.msk.f32.gmra.mxu1 %vm324_vm1, %v312_v23  ;;  %1386 = vmatprep.subr.mxu0 %v1621_v1 }
  0x30   : > { %1343 = vmatprep.mubr.msk.f32.mxu1 %vm1622_vm0, %v1621_v1  ;;  %1387 = vmatpush3.msra.mxu0 %v706_v28 }
  0x31   : > { %1307 = vmatmul.mubr.msk.f32.gmra.mxu0 %vm324_vm1, %v306_v24  ;;  %1388 = vmatprep.subr.mxu0 %v1621_v1 }
  0x32   : > { %1390 = vmatprep.mubr.msk.f32.mxu0 %vm1622_vm0, %v1621_v1  ;;  %1389 = vmatpush3.msra.mxu0 %v705_v29 }
  0xd9   : > { %v430_v31 = vpop.f32.mrf.mxu0 }
  0xda   : > { %v431_v32 = vadd.f32 %v1829_v30, %v430_v31 }
  0xdb   : > { %v1290_v33 = vpop.f32.mrf.mxu0  ;;  %v465_v34 = vpop.f32.mrf.mxu1 }
  0xdc   : > { %v494_v35 = vmax.f32 %v431_v32, 0.0  ;;  %v466_v6 = vadd.f32 %v1829_v30, %v465_v34 }
  0xdd   : > { %v435_v36 = vpop.f32.mrf.mxu0  ;;  %v1311_v37 = vpop.f32.mrf.mxu1 }
  0xde   : > { %v436_v38 = vadd.f32 %v1829_v30, %v435_v36  ;;  %1344 = vmatmul.mubr.msk.f32.vlgmr.msra.gmra.mxu1 %vm522_vm2, %v494_v35  ;;  %v501_v9 = vmax.f32 %v466_v6, 0.0 }
  0xdf   : > { %v1293_v39 = vpop.f32.mrf.mxu0  ;;  %1346 = vmatprep.mubr.msk.f32.mxu1 %vm1622_vm0, %v1621_v1  ;;  %v470_v40 = vpop.f32.mrf.mxu1 }
  0xe0   : > { %v495_v41 = vmax.f32 %v436_v38, 0.0  ;;  %v471_v10 = vadd.f32 %v1829_v30, %v470_v40 }
  0xe1   : > { %v440_v42 = vpop.f32.mrf.mxu0  ;;  %v1314_v43 = vpop.f32.mrf.mxu1 }
  0xe2   : > { %v441_v44 = vadd.f32 %v1829_v30, %v440_v42  ;;  %1347 = vmatmul.mubr.msk.f32.gmra.mxu1 %vm522_vm2, %v495_v41  ;;  %v502_v11 = vmax.f32 %v471_v10, 0.0  ;;  %v1198_v10 = vld [vmem:[%s2063_s6] ss:$0 sm:$0xff] }
  0xe3   : > { %v1296_v45 = vpop.f32.mrf.mxu0  ;;  %1349 = vmatprep.mubr.msk.f32.mxu1 %vm1622_vm0, %v1621_v1  ;;  %v475_v46 = vpop.f32.mrf.mxu1 }
  0xe4   : > { %v496_v47 = vmax.f32 %v441_v44, 0.0  ;;  %v476_v12 = vadd.f32 %v1829_v30, %v475_v46 }
  0xe5   : > { %v445_v48 = vpop.f32.mrf.mxu0  ;;  %v1317_v49 = vpop.f32.mrf.mxu1 }
  0xe6   : > { %v446_v50 = vadd.f32 %v1829_v30, %v445_v48  ;;  %1350 = vmatmul.mubr.msk.f32.gmra.mxu1 %vm522_vm2, %v496_v47  ;;  %v503_v13 = vmax.f32 %v476_v12, 0.0 }
  0xe7   : > { %v1299_v51 = vpop.f32.mrf.mxu0  ;;  %1352 = vmatprep.mubr.msk.f32.mxu1 %vm1622_vm0, %v1621_v1  ;;  %v480_v52 = vpop.f32.mrf.mxu1 }
  0xe8   : > { %v497_v53 = vmax.f32 %v446_v50, 0.0  ;;  %v481_v14 = vadd.f32 %v1829_v30, %v480_v52 }
  0xe9   : > { %v450_v54 = vpop.f32.mrf.mxu0  ;;  %v1320_v55 = vpop.f32.mrf.mxu1 }
  0xea   : > { %v451_v56 = vadd.f32 %v1829_v30, %v450_v54  ;;  %1353 = vmatmul.mubr.msk.f32.gmra.mxu1 %vm522_vm2, %v497_v53  ;;  %v504_v15 = vmax.f32 %v481_v14, 0.0 }
  0xeb   : > { %v1302_v57 = vpop.f32.mrf.mxu0  ;;  %1355 = vmatprep.mubr.msk.f32.mxu1 %vm1622_vm0, %v1621_v1  ;;  %v485_v58 = vpop.f32.mrf.mxu1 }
  0xec   : > { %v498_v59 = vmax.f32 %v451_v56, 0.0  ;;  %v486_v16 = vadd.f32 %v1829_v30, %v485_v58 }
  0xed   : > { %v455_v60 = vpop.f32.mrf.mxu0  ;;  %v1323_v61 = vpop.f32.mrf.mxu1 }
  0xee   : > { %v456_v62 = vadd.f32 %v1829_v30, %v455_v60  ;;  %1356 = vmatmul.mubr.msk.f32.gmra.mxu1 %vm522_vm2, %v498_v59  ;;  %v505_v17 = vmax.f32 %v486_v16, 0.0 }
  0xef   : > { %v1305_v63 = vpop.f32.mrf.mxu0  ;;  %1358 = vmatprep.mubr.msk.f32.mxu1 %vm1622_vm0, %v1621_v1  ;;  %v490_v0 = vpop.f32.mrf.mxu1 }
  0xf0   : > { %v499_v2 = vmax.f32 %v456_v62, 0.0  ;;  %v491_v18 = vadd.f32 %v1829_v30, %v490_v0 }
  0xf1   : > { %v460_v3 = vpop.f32.mrf.mxu0  ;;  %v1326_v4 = vpop.f32.mrf.mxu1 }
  0xf2   : > { %v461_v5 = vadd.f32 %v1829_v30, %v460_v3  ;;  %1359 = vmatmul.mubr.msk.f32.gmra.mxu1 %vm522_vm2, %v499_v2  ;;  %v506_v19 = vmax.f32 %v491_v18, 0.0 }
  0xf3   : > { %v1308_v7 = vpop.f32.mrf.mxu0  ;;  %1361 = vmatprep.mubr.msk.f32.mxu1 %vm1622_vm0, %v1621_v1 }
  0xf4   : > { %v500_v8 = vmax.f32 %v461_v5, 0.0 }
  0xf6   : > { %1362 = vmatmul.mubr.msk.f32.gmra.mxu1 %vm522_vm2, %v500_v8 }
  0xf7   : > { %1364 = vmatprep.mubr.msk.f32.mxu1 %vm1622_vm0, %v1621_v1 }
  0xfa   : > { %1365 = vmatmul.mubr.msk.f32.gmra.mxu1 %vm522_vm2, %v501_v9 }
  0xfb   : > { %1367 = vmatprep.mubr.msk.f32.mxu1 %vm1622_vm0, %v1621_v1 }
  0xfe   : > { %1368 = vmatmul.mubr.msk.f32.gmra.mxu1 %vm522_vm2, %v502_v11 }
  0xff   : > { %1370 = vmatprep.mubr.msk.f32.mxu1 %vm1622_vm0, %v1621_v1 }
 0x102   : > { %1371 = vmatmul.mubr.msk.f32.gmra.mxu1 %vm522_vm2, %v503_v13 }
 0x103   : > { %1373 = vmatprep.mubr.msk.f32.mxu1 %vm1622_vm0, %v1621_v1 }
 0x106   : > { %1374 = vmatmul.mubr.msk.f32.gmra.mxu1 %vm522_vm2, %v504_v15 }
 0x107   : > { %1376 = vmatprep.mubr.msk.f32.mxu1 %vm1622_vm0, %v1621_v1 }
 0x10a   : > { %1377 = vmatmul.mubr.msk.f32.gmra.mxu1 %vm522_vm2, %v505_v17 }
 0x10b   : > { %1379 = vmatprep.mubr.msk.f32.mxu1 %vm1622_vm0, %v1621_v1 }
 0x10e   : > { %1380 = vmatmul.mubr.msk.f32.gmra.mxu1 %vm522_vm2, %v506_v19 }
 0x19e   : > { %v628_v21 = vpop.f32.mrf.mxu1 }
 0x19f   : > { %v629_v22 = vadd.f32 %v1884_v20, %v628_v21 }
 0x1a0   : > { %v1345_v23 = vpop.f32.mrf.mxu1 }
 0x1a1   : > { %v692_v24 = vmax.f32 %v629_v22, 0.0 }
 0x1a2   : > { %v633_v25 = vpop.f32.mrf.mxu1 }
 0x1a3   : > { %v634_v26 = vadd.f32 %v1884_v20, %v633_v25  ;;  %1391 = vmatmul.mubr.msk.f32.vlgmr.msra.gmra.mxu0 %vm324_vm1, %v692_v24 }
 0x1a4   : > { %v1348_v27 = vpop.f32.mrf.mxu1  ;;  %1393 = vmatprep.mubr.msk.f32.mxu0 %vm1622_vm0, %v1621_v1 }
 0x1a5   : > { %v693_v28 = vmax.f32 %v634_v26, 0.0 }
 0x1a6   : > { %v638_v29 = vpop.f32.mrf.mxu1 }
 0x1a7   : > { %v639_v30 = vadd.f32 %v1884_v20, %v638_v29  ;;  %1394 = vmatmul.mubr.msk.f32.gmra.mxu0 %vm324_vm1, %v693_v28 }
 0x1a8   : > { %v1351_v31 = vpop.f32.mrf.mxu1  ;;  %1396 = vmatprep.mubr.msk.f32.mxu0 %vm1622_vm0, %v1621_v1 }
 0x1a9   : > { %v694_v32 = vmax.f32 %v639_v30, 0.0 }
 0x1aa   : > { %v643_v33 = vpop.f32.mrf.mxu1 }
 0x1ab   : > { %v644_v34 = vadd.f32 %v1884_v20, %v643_v33  ;;  %1397 = vmatmul.mubr.msk.f32.gmra.mxu0 %vm324_vm1, %v694_v32 }
 0x1ac   : > { %v1354_v35 = vpop.f32.mrf.mxu1  ;;  %1399 = vmatprep.mubr.msk.f32.mxu0 %vm1622_vm0, %v1621_v1 }
 0x1ad   : > { %v695_v36 = vmax.f32 %v644_v34, 0.0 }
 0x1ae   : > { %v648_v37 = vpop.f32.mrf.mxu1 }
 0x1af   : > { %v649_v38 = vadd.f32 %v1884_v20, %v648_v37  ;;  %1400 = vmatmul.mubr.msk.f32.gmra.mxu0 %vm324_vm1, %v695_v36 }
 0x1b0   : > { %v1357_v39 = vpop.f32.mrf.mxu1  ;;  %1402 = vmatprep.mubr.msk.f32.mxu0 %vm1622_vm0, %v1621_v1 }
 0x1b1   : > { %v696_v40 = vmax.f32 %v649_v38, 0.0 }
 0x1b2   : > { %v653_v41 = vpop.f32.mrf.mxu1 }
 0x1b3   : > { %v654_v42 = vadd.f32 %v1884_v20, %v653_v41  ;;  %1403 = vmatmul.mubr.msk.f32.gmra.mxu0 %vm324_vm1, %v696_v40 }
 0x1b4   : > { %v1360_v43 = vpop.f32.mrf.mxu1  ;;  %1405 = vmatprep.mubr.msk.f32.mxu0 %vm1622_vm0, %v1621_v1 }
 0x1b5   : > { %v697_v44 = vmax.f32 %v654_v42, 0.0 }
 0x1b6   : > { %v658_v45 = vpop.f32.mrf.mxu1 }
 0x1b7   : > { %v659_v46 = vadd.f32 %v1884_v20, %v658_v45  ;;  %1406 = vmatmul.mubr.msk.f32.gmra.mxu0 %vm324_vm1, %v697_v44 }
 0x1b8   : > { %v1363_v47 = vpop.f32.mrf.mxu1  ;;  %1408 = vmatprep.mubr.msk.f32.mxu0 %vm1622_vm0, %v1621_v1 }
 0x1b9   : > { %v698_v48 = vmax.f32 %v659_v46, 0.0 }
 0x1ba   : > { %v663_v49 = vpop.f32.mrf.mxu1 }
 0x1bb   : > { %v664_v50 = vadd.f32 %v1884_v20, %v663_v49  ;;  %1409 = vmatmul.mubr.msk.f32.gmra.mxu0 %vm324_vm1, %v698_v48 }
 0x1bc   : > { %v1366_v51 = vpop.f32.mrf.mxu1  ;;  %1411 = vmatprep.mubr.msk.f32.mxu0 %vm1622_vm0, %v1621_v1 }
 0x1bd   : > { %v699_v52 = vmax.f32 %v664_v50, 0.0 }
 0x1be   : > { %v668_v53 = vpop.f32.mrf.mxu1 }
 0x1bf   : > { %v669_v54 = vadd.f32 %v1884_v20, %v668_v53  ;;  %1412 = vmatmul.mubr.msk.f32.gmra.mxu0 %vm324_vm1, %v699_v52 }
 0x1c0   : > { %v1369_v55 = vpop.f32.mrf.mxu1  ;;  %1414 = vmatprep.mubr.msk.f32.mxu0 %vm1622_vm0, %v1621_v1 }
 0x1c1   : > { %v700_v56 = vmax.f32 %v669_v54, 0.0 }
 0x1c2   : > { %v673_v57 = vpop.f32.mrf.mxu1 }
 0x1c3   : > { %v674_v58 = vadd.f32 %v1884_v20, %v673_v57  ;;  %1415 = vmatmul.mubr.msk.f32.gmra.mxu0 %vm324_vm1, %v700_v56 }
 0x1c4   : > { %v1372_v59 = vpop.f32.mrf.mxu1  ;;  %1417 = vmatprep.mubr.msk.f32.mxu0 %vm1622_vm0, %v1621_v1 }
 0x1c5   : > { %v701_v60 = vmax.f32 %v674_v58, 0.0 }
 0x1c6   : > { %v678_v61 = vpop.f32.mrf.mxu1 }
 0x1c7   : > { %v679_v62 = vadd.f32 %v1884_v20, %v678_v61  ;;  %1418 = vmatmul.mubr.msk.f32.gmra.mxu0 %vm324_vm1, %v701_v60 }
 0x1c8   : > { %v1375_v63 = vpop.f32.mrf.mxu1  ;;  %1420 = vmatprep.mubr.msk.f32.mxu0 %vm1622_vm0, %v1621_v1 }
 0x1c9   : > { %v702_v0 = vmax.f32 %v679_v62, 0.0 }
 0x1ca   : > { %v683_v2 = vpop.f32.mrf.mxu1 }
 0x1cb   : > { %v684_v3 = vadd.f32 %v1884_v20, %v683_v2  ;;  %1421 = vmatmul.mubr.msk.f32.gmra.mxu0 %vm324_vm1, %v702_v0 }
 0x1cc   : > { %v1378_v4 = vpop.f32.mrf.mxu1  ;;  %1423 = vmatprep.mubr.msk.f32.mxu0 %vm1622_vm0, %v1621_v1 }
 0x1cd   : > { %v703_v5 = vmax.f32 %v684_v3, 0.0 }
 0x1ce   : > { %v688_v6 = vpop.f32.mrf.mxu1 }
 0x1cf   : > { %v689_v7 = vadd.f32 %v1884_v20, %v688_v6  ;;  %1424 = vmatmul.mubr.msk.f32.gmra.mxu0 %vm324_vm1, %v703_v5 }
 0x1d0   : > { %v1381_v8 = vpop.f32.mrf.mxu1  ;;  %1426 = vmatprep.mubr.msk.f32.mxu0 %vm1622_vm0, %v1621_v1 }
 0x1d1   : > { %v704_v9 = vmax.f32 %v689_v7, 0.0 }
 0x1d3   : > { %1427 = vmatmul.mubr.msk.f32.gmra.mxu0 %vm324_vm1, %v704_v9 }
 0x263   : > { %v821_v11 = vpop.f32.mrf.mxu0 }
 0x264   : > { %v822_v12 = vadd.f32 %v1198_v10, %v821_v11 }
 0x265   : > { %v1392_v13 = vpop.f32.mrf.mxu0 }
 0x266   : > { %886 = vst.msk [vmem:[%s1940_s29] sm:$0xff] %vm885_vm3, %v822_v12 }
 0x267   : > { %v826_v1 = vpop.f32.mrf.mxu0 }
 0x268   : > { %v827_v14 = vadd.f32 %v1198_v10, %v826_v1 }
 0x269   : > { %v1395_v15 = vpop.f32.mrf.mxu0 }
 0x26a   : > { %887 = vst.msk [vmem:[%s1940_s29 + $0x8] sm:$0xff] %vm885_vm3, %v827_v14 }
 0x26b   : > { %v831_v16 = vpop.f32.mrf.mxu0 }
 0x26c   : > { %v832_v17 = vadd.f32 %v1198_v10, %v831_v16 }
 0x26d   : > { %v1398_v18 = vpop.f32.mrf.mxu0 }
 0x26e   : > { %888 = vst.msk [vmem:[%s1940_s29 + $0x10] sm:$0xff] %vm885_vm3, %v832_v17 }
 0x26f   : > { %v836_v19 = vpop.f32.mrf.mxu0 }
 0x270   : > { %v837_v20 = vadd.f32 %v1198_v10, %v836_v19 }
 0x271   : > { %v1401_v21 = vpop.f32.mrf.mxu0 }
 0x272   : > { %889 = vst.msk [vmem:[%s1940_s29 + $0x18] sm:$0xff] %vm885_vm3, %v837_v20 }
 0x273   : > { %v841_v22 = vpop.f32.mrf.mxu0 }
 0x274   : > { %v842_v23 = vadd.f32 %v1198_v10, %v841_v22 }
 0x275   : > { %v1404_v24 = vpop.f32.mrf.mxu0 }
 0x276   : > { %890 = vst.msk [vmem:[%s1940_s29 + $0x20] sm:$0xff] %vm885_vm3, %v842_v23 }
 0x277   : > { %v846_v25 = vpop.f32.mrf.mxu0 }
 0x278   : > { %v847_v26 = vadd.f32 %v1198_v10, %v846_v25 }
 0x279   : > { %v1407_v27 = vpop.f32.mrf.mxu0 }
 0x27a   : > { %891 = vst.msk [vmem:[%s1940_s29 + $0x28] sm:$0xff] %vm885_vm3, %v847_v26 }
 0x27b   : > { %v851_v28 = vpop.f32.mrf.mxu0 }
 0x27c   : > { %v852_v29 = vadd.f32 %v1198_v10, %v851_v28 }
 0x27d   : > { %v1410_v30 = vpop.f32.mrf.mxu0 }
 0x27e   : > { %892 = vst.msk [vmem:[%s1940_s29 + $0x30] sm:$0xff] %vm885_vm3, %v852_v29 }
 0x27f   : > { %v856_v31 = vpop.f32.mrf.mxu0 }
 0x280   : > { %v857_v32 = vadd.f32 %v1198_v10, %v856_v31 }
 0x281   : > { %v1413_v33 = vpop.f32.mrf.mxu0 }
 0x282   : > { %893 = vst.msk [vmem:[%s1940_s29 + $0x38] sm:$0xff] %vm885_vm3, %v857_v32 }
 0x283   : > { %v861_v34 = vpop.f32.mrf.mxu0 }
 0x284   : > { %v862_v35 = vadd.f32 %v1198_v10, %v861_v34 }
 0x285   : > { %v1416_v36 = vpop.f32.mrf.mxu0 }
 0x286   : > { %894 = vst.msk [vmem:[%s1940_s29 + $0x40] sm:$0xff] %vm885_vm3, %v862_v35 }
 0x287   : > { %v866_v37 = vpop.f32.mrf.mxu0 }
 0x288   : > { %v867_v38 = vadd.f32 %v1198_v10, %v866_v37 }
 0x289   : > { %v1419_v39 = vpop.f32.mrf.mxu0 }
 0x28a   : > { %895 = vst.msk [vmem:[%s1940_s29 + $0x48] sm:$0xff] %vm885_vm3, %v867_v38 }
 0x28b   : > { %v871_v40 = vpop.f32.mrf.mxu0 }
 0x28c   : > { %v872_v41 = vadd.f32 %v1198_v10, %v871_v40 }
 0x28d   : > { %v1422_v42 = vpop.f32.mrf.mxu0 }
 0x28e   : > { %896 = vst.msk [vmem:[%s1940_s29 + $0x50] sm:$0xff] %vm885_vm3, %v872_v41 }
 0x28f   : > { %v876_v43 = vpop.f32.mrf.mxu0 }
 0x290   : > { %v877_v44 = vadd.f32 %v1198_v10, %v876_v43 }
 0x291   : > { %v1425_v45 = vpop.f32.mrf.mxu0 }
 0x292   : > { %897 = vst.msk [vmem:[%s1940_s29 + $0x58] sm:$0xff] %vm885_vm3, %v877_v44  ;;  %905 = sbr.rel (!%p1688_p4) target bundleno = 716 (0x2cc), region = 52 }
 0x293   : > { %v881_v46 = vpop.f32.mrf.mxu0 }
 0x294   : > { %v882_v47 = vadd.f32 %v1198_v10, %v881_v46 }
 0x295   : > { %v1428_v48 = vpop.f32.mrf.mxu0 }
 0x296   : > { %898 = vst.msk [vmem:[%s1940_s29 + $0x60] sm:$0xff] %vm885_vm3, %v882_v47 }
 0x297   : > { %s2073_s24 = smov (!%p908_p8, %s907_s24), 13 }
 0x298   : > { %s1212_s13 = sshll.u32 %s2073_s24, 7 }
 0x299   : > { %p1215_p9 = scmp.eq.s32.totalorder %s1212_s13, 0 }
 0x29a   : > { %1529 = sdivrem.u32 (!%p1215_p9), %s2073_s24, 13 }
 0x29b   : > { %916 = sbr.rel (%p1215_p9) target bundleno = 716 (0x2cc), region = 56 }
 0x2a3   : > { %s1981_s9 = spop.drf %1529 }
 0x2a4   : > { %p1216_p10 = scmp.le.s32.totalorder %s1981_s9, 0 }
 0x2a5   : > { %s2066_s27 = smov (!%p1216_p10), %s1975_s11  ;;  %s2067_s12 = smov (!%p1216_p10), %s1940_s29 }
 0x2a6   : > { %1121 = sbr.rel (%p1216_p10) target bundleno = 691 (0x2b3), region = 132  ;;  %s1990_s14 = smov (!%p1216_p10), 0  }
 0x2a7   : > { %s1992_s15 = smov (!%p1216_p10), 0  }
 0x2ab LB: >> { %v1005_v49 = vld [vmem:[%s1595_s12] sm:$0xff]  ;;  %v1007_v50 = vld [vmem:[%s1595_s12 + $0x8] sm:$0xff]  ;;  %v1009_v51 = vld [vmem:[%s1595_s12 + $0x10] sm:$0xff]  ;;  %s1031_s16 = sadd.s32 1, %s1599_s14  ;;  %s999_s15 = sadd.s32 1, %s1603_s15   ;;  %s1603_s15 = sphi %s1992_s15, %s999_s15   ;;  %s1599_s14 = sphi %s1990_s14, %s2068_s14   ;;  %s1595_s12 = sphi %s2067_s12, %s1036_s12   ;;  %s1591_s27 = sphi %s2066_s27, %s1037_s27  }
 0x2ac   : >> { %1006 = vst [vmem:[%s1591_s27] sm:$0xff] %v1005_v49  ;;  %1008 = vst [vmem:[%s1591_s27 + $0x8] sm:$0xff] %v1007_v50  ;;  %v1011_v52 = vld [vmem:[%s1595_s12 + $0x18] sm:$0xff]  ;;  %v1013_v53 = vld [vmem:[%s1595_s12 + $0x20] sm:$0xff]  ;;  %p1032_p11 = scmp.ge.s32.totalorder %s1031_s16, %s1981_s9  ;;  %p998_p12 = scmp.ge.s32.totalorder %s999_s15, %s1981_s9 }
 0x2ad   : >> { %1010 = vst [vmem:[%s1591_s27 + $0x10] sm:$0xff] %v1009_v51  ;;  %v1015_v54 = vld [vmem:[%s1595_s12 + $0x28] sm:$0xff]  ;;  %1012 = vst [vmem:[%s1591_s27 + $0x18] sm:$0xff] %v1011_v52  ;;  %v1017_v55 = vld [vmem:[%s1595_s12 + $0x30] sm:$0xff] }
 0x2ae   : >> { %1014 = vst [vmem:[%s1591_s27 + $0x20] sm:$0xff] %v1013_v53  ;;  %1016 = vst [vmem:[%s1591_s27 + $0x28] sm:$0xff] %v1015_v54  ;;  %v1019_v56 = vld [vmem:[%s1595_s12 + $0x38] sm:$0xff]  ;;  %v1021_v57 = vld [vmem:[%s1595_s12 + $0x40] sm:$0xff]  ;;  %s2075_s16 = smov (%p1032_p11, %s1031_s16), 0  ;;  %1001 = sbr.rel (!%p998_p12) target bundleno = 683 (0x2ab), region = 138 }
 0x2af   : >> { %1018 = vst [vmem:[%s1591_s27 + $0x30] sm:$0xff] %v1017_v55  ;;  %1020 = vst [vmem:[%s1591_s27 + $0x38] sm:$0xff] %v1019_v56  ;;  %v1023_v58 = vld [vmem:[%s1595_s12 + $0x48] sm:$0xff]  ;;  %v1025_v59 = vld [vmem:[%s1595_s12 + $0x50] sm:$0xff]  ;;  %s1034_s17 = smul.u32 104, %s2075_s16  ;;  %s2068_s14 = smov %s2075_s16 }
 0x2b0   : >> { %1022 = vst [vmem:[%s1591_s27 + $0x40] sm:$0xff] %v1021_v57  ;;  %v1027_v60 = vld [vmem:[%s1595_s12 + $0x58] sm:$0xff]  ;;  %1024 = vst [vmem:[%s1591_s27 + $0x48] sm:$0xff] %v1023_v58  ;;  %v1029_v61 = vld [vmem:[%s1595_s12 + $0x60] sm:$0xff] }
 0x2b1   : >> { %1026 = vst [vmem:[%s1591_s27 + $0x50] sm:$0xff] %v1025_v59  ;;  %1028 = vst [vmem:[%s1591_s27 + $0x58] sm:$0xff] %v1027_v60  ;;  %s1036_s12 = scalar_lea.vmem %s1940_s29, %s1034_s17 [#allocation2]  }
 0x2b2   : >> { %1030 = vst [vmem:[%s1591_s27 + $0x60] sm:$0xff] %v1029_v61  ;;  %s1037_s27 = scalar_lea.vmem %s1975_s11, %s1034_s17  }
 0x2b3 PF: > { %1531 = sdivrem.u32 %s2073_s24, 13 }
 0x2b4   : > { %s1217_s18 = smul.u32 104, %s1981_s9 }
 0x2b6   : > { %s1042_s19 = scalar_lea.vmem %s1940_s29, %s1217_s18 [#allocation2]   ;;  %s1044_s20 = scalar_lea.vmem %s1975_s11, %s1217_s18  }
 0x2bc   : > { %s1532_s21 = spop.drf %1531 }
 0x2bd   : > { %p1219_p13 = scmp.le.s32.totalorder %s1532_s21, 0 }
 0x2be   : > { %s1605_s22 = smov (!%p1219_p13), %s1044_s20   ;;  %s1609_s26 = smov (!%p1219_p13), %s1042_s19  }
 0x2bf   : > { %1135 = sbr.rel (%p1219_p13) target bundleno = 716 (0x2cc), region = 143  ;;  %s1613_s30 = smov (!%p1219_p13), 0  }
 0x2c0   : > { %s1617_s23 = smov (!%p1219_p13), 0  }
 0x2c4 LB: >> { %v1054_v62 = vld [vmem:[%s1611_s26] sm:$0xff]  ;;  %s1056_s10 = sadd.s32 1, %s1615_s30  ;;  %s1048_s23 = sadd.s32 1, %s1619_s23   ;;  %s1619_s23 = sphi %s1617_s23, %s1048_s23   ;;  %s1615_s30 = sphi %s1613_s30, %s1614_s30   ;;  %s1611_s26 = sphi %s1609_s26, %s1061_s26   ;;  %s1607_s22 = sphi %s1605_s22, %s1062_s22  }
 0x2c5   : >> { %1055 = vst [vmem:[%s1607_s22] sm:$0xff] %v1054_v62  ;;  %p1057_p0 = scmp.ge.s32.totalorder %s1056_s10, %s1532_s21  ;;  %p1047_p1 = scmp.ge.s32.totalorder %s1048_s23, %s1532_s21 }
 0x2c7   : >> { %s2077_s10 = smov (%p1057_p0, %s1056_s10), 0  ;;  %1050 = sbr.rel (!%p1047_p1) target bundleno = 708 (0x2c4), region = 149 }
 0x2c8   : >> { %s1220_s29 = sshll.u32 %s2077_s10, 3  ;;  %s1614_s30 = smov %s2077_s10  }
 0x2c9   : >> { %s1061_s26 = scalar_lea.vmem %s1042_s19, %s1220_s29 [#allocation2]   ;;  %s1062_s22 = scalar_lea.vmem %s1044_s20, %s1220_s29  }
 0x2cc PF: > { %p14_p2 = scmp.ge.s32.totalorder %s1678_s28, 4   ;;  %s2069_s24 = smov %s1583_s25 }
 0x2cd   : > { %s2070_s25 = smov %s1686_s8  ;;  %s2071_s26 = smov %s1678_s28 }
 0x2ce   :  { %16 = sbr.rel (!%p14_p2) target bundleno = 2 (0x2), region = 160 }

</bundles_post_ra>
